<compile_context>
chip_gen: v5e
topology: v5e:2x2
jax: 0.10.0
libtpu: 0.0.40
codegen_flags: <defaults>
</compile_context>

<pallas_src>
import jax
import jax.numpy as jnp
from jax.experimental import pallas as pl
from jax.experimental.pallas import tpu as pltpu

LANE = 128
_NEG_BIG = -1e30  # mask value for padded logit columns


def _round_up(n, m):
    return (n + m - 1) // m * m


def mlp_kernel(x_ref, w1_ref, b1_ref, w2_ref, b2_ref, wo_ref, bo_ref, out_ref):
    # Hidden layer 1: Linear (bf16 MXU, f32 accum) -> ReLU.  Dropout = identity (eval).
    h = jnp.dot(x_ref[...], w1_ref[...], preferred_element_type=jnp.float32)
    h = jnp.maximum(h + b1_ref[...], 0.0)

    # Hidden layer 2: Linear -> ReLU.
    h = jnp.dot(h.astype(jnp.bfloat16), w2_ref[...],
                preferred_element_type=jnp.float32)
    h = jnp.maximum(h + b2_ref[...], 0.0)

    # Output layer: Linear -> log_softmax over the lane (feature) axis.
    logits = jnp.dot(h.astype(jnp.bfloat16), wo_ref[...],
                     preferred_element_type=jnp.float32)
    # Padded output columns carry a -1e30 bias => exp() underflows to 0, so the
    # normalizer only sees the real classes.
    logits = logits + bo_ref[...]

    m = jnp.max(logits, axis=1, keepdims=True)           # XLU cross-lane max
    shifted = logits - m
    lse = jnp.log(jnp.sum(jnp.exp(shifted), axis=1, keepdims=True))
    out_ref[...] = shifted - lse


def mlp_forward(x, w1, b1, w2, b2, wo, bo, *, tb=512):
    """x: (B, in).  Weights stored (in, out), biases (1, out)."""
    B, in_size = x.shape
    h1 = w1.shape[1]
    h2 = w2.shape[1]
    out_size = wo.shape[1]

    # ---- host-side prep: lane-pad feature dims, cast weights to bf16 --------
    h1p = _round_up(h1, LANE)
    h2p = _round_up(h2, LANE)
    outp = _round_up(out_size, LANE)

    bf16 = jnp.bfloat16
    w1p = jnp.zeros((in_size, h1p), bf16).at[:, :h1].set(w1.astype(bf16))
    b1p = jnp.zeros((1, h1p), jnp.float32).at[:, :h1].set(b1.astype(jnp.float32))
    w2p = jnp.zeros((h1p, h2p), bf16).at[:h1, :h2].set(w2.astype(bf16))
    b2p = jnp.zeros((1, h2p), jnp.float32).at[:, :h2].set(b2.astype(jnp.float32))
    wop = jnp.zeros((h2p, outp), bf16).at[:h2, :out_size].set(wo.astype(bf16))
    bop = jnp.full((1, outp), _NEG_BIG, jnp.float32).at[:, :out_size].set(
        bo.astype(jnp.float32))

    # ---- batch tiling: tile rows are a multiple of 8 sublanes ---------------
    tb_eff = _round_up(min(int(tb), _round_up(B, 8)), 8)
    b_pad = _round_up(B, tb_eff)
    xp = jnp.zeros((b_pad, in_size), bf16).at[:B, :].set(x.astype(bf16))

    grid = (b_pad // tb_eff,)

    flops = 2 * b_pad * (in_size * h1p + h1p * h2p + h2p * outp)
    bytes_accessed = (xp.size * 2
                      + (w1p.size + w2p.size + wop.size) * 2
                      + (b1p.size + b2p.size + bop.size) * 4
                      + b_pad * outp * 4)
    cost = pl.CostEstimate(flops=flops,
                           transcendentals=b_pad * (outp + 1),
                           bytes_accessed=bytes_accessed)

    const = lambda i: (0, 0)
    out_pad = pl.pallas_call(
        mlp_kernel,
        out_shape=jax.ShapeDtypeStruct((b_pad, outp), jnp.float32),
        grid=grid,
        in_specs=[
            pl.BlockSpec((tb_eff, in_size), lambda i: (i, 0)),  # x tile
            pl.BlockSpec((in_size, h1p), const),                # weights stay resident
            pl.BlockSpec((1, h1p), const),
            pl.BlockSpec((h1p, h2p), const),
            pl.BlockSpec((1, h2p), const),
            pl.BlockSpec((h2p, outp), const),
            pl.BlockSpec((1, outp), const),
        ],
        out_specs=pl.BlockSpec((tb_eff, outp), lambda i: (i, 0)),
        compiler_params=pltpu.CompilerParams(
            dimension_semantics=("parallel",)),
        cost_estimate=cost,
    )(xp, w1p, b1p, w2p, b2p, wop, bop)

    # Drop padded batch rows and padded logit columns.
    return out_pad[:B, :out_size]


def reference_forward(x, w1, b1, w2, b2, wo, bo):
    """bf16-matched pure-JAX reference (same casts as the kernel)."""
    bf16 = jnp.bfloat16
    h = jnp.dot(x.astype(bf16), w1.astype(bf16),
                preferred_element_type=jnp.float32) + b1
    h = jnp.maximum(h, 0.0)
    h = jnp.dot(h.astype(bf16), w2.astype(bf16),
                preferred_element_type=jnp.float32) + b2
    h = jnp.maximum(h, 0.0)
    logits = jnp.dot(h.astype(bf16), wo.astype(bf16),
                     preferred_element_type=jnp.float32) + bo
    return jax.nn.log_softmax(logits, axis=1)


if __name__ == "__main__":
    # Network(input_size=32, output_size=10, hidden_size=[64, 32])
    input_size = 32
    hidden_size = [64, 32]
    output_size = 10
    batch = 8

    key = jax.random.PRNGKey(0)
    keys = jax.random.split(key, 8)

    x = jax.random.normal(keys[0], (batch, input_size), dtype=jnp.float32)

    # Deterministic parameter init (stored as (in, out), biases as (1, out)).
    w1 = jax.random.normal(keys[1], (input_size, hidden_size[0]), jnp.float32) * 0.1
    b1 = jax.random.normal(keys[2], (1, hidden_size[0]), jnp.float32) * 0.1
    w2 = jax.random.normal(keys[3], (hidden_size[0], hidden_size[1]), jnp.float32) * 0.1
    b2 = jax.random.normal(keys[4], (1, hidden_size[1]), jnp.float32) * 0.1
    wo = jax.random.normal(keys[5], (hidden_size[1], output_size), jnp.float32) * 0.1
    bo = jax.random.normal(keys[6], (1, output_size), jnp.float32) * 0.1

    # Single-tile path (B=8 -> one grid step).
    out = mlp_forward(x, w1, b1, w2, b2, wo, bo)
    out = jax.block_until_ready(out)
    ref = reference_forward(x, w1, b1, w2, b2, wo, bo)
    assert out.shape == (batch, output_size)
    assert jnp.allclose(out, ref, atol=1e-2, rtol=1e-2), "mismatch vs reference"

    # Multi-step tiled path (B=24, tile=8 -> grid=(3,)) to exercise pipelining.
    x2 = jax.random.normal(keys[7], (24, input_size), dtype=jnp.float32)
    out2 = jax.block_until_ready(mlp_forward(x2, w1, b1, w2, b2, wo, bo, tb=8))
    ref2 = reference_forward(x2, w1, b1, w2, b2, wo, bo)
    assert out2.shape == (24, output_size)
    assert jnp.allclose(out2, ref2, atol=1e-2, rtol=1e-2), "tiled mismatch vs reference"

    print("KERNEL_OK")
</pallas_src>

<mosaic_0001>
module attributes {stable_mosaic.version = 11 : i64} {
  func.func @mlp_kernel(%arg0: i32, %arg1: memref<8x32xbf16, #tpu.memory_space<vmem>>, %arg2: memref<32x128xbf16, #tpu.memory_space<vmem>>, %arg3: memref<1x128xf32, #tpu.memory_space<vmem>>, %arg4: memref<128x128xbf16, #tpu.memory_space<vmem>>, %arg5: memref<1x128xf32, #tpu.memory_space<vmem>>, %arg6: memref<128x128xbf16, #tpu.memory_space<vmem>>, %arg7: memref<1x128xf32, #tpu.memory_space<vmem>>, %arg8: memref<8x128xf32, #tpu.memory_space<vmem>>) attributes {dimension_semantics = [#tpu.dimension_semantics<parallel>], iteration_bounds = array<i64: 1>, scalar_prefetch = 0 : i64, scratch_operands = 0 : i64, tpu.core_type = #tpu.core_type<tc>, window_params = [{transform_indices = @transform_0, window_bounds = array<i64: 8, 32>}, {pipeline_mode = #tpu.pipeline_mode<synchronous>, transform_indices = @transform_1, window_bounds = array<i64: 32, 128>}, {pipeline_mode = #tpu.pipeline_mode<synchronous>, transform_indices = @transform_2, window_bounds = array<i64: 1, 128>}, {pipeline_mode = #tpu.pipeline_mode<synchronous>, transform_indices = @transform_3, window_bounds = array<i64: 128, 128>}, {pipeline_mode = #tpu.pipeline_mode<synchronous>, transform_indices = @transform_4, window_bounds = array<i64: 1, 128>}, {pipeline_mode = #tpu.pipeline_mode<synchronous>, transform_indices = @transform_5, window_bounds = array<i64: 128, 128>}, {pipeline_mode = #tpu.pipeline_mode<synchronous>, transform_indices = @transform_6, window_bounds = array<i64: 1, 128>}, {transform_indices = @transform_7, window_bounds = array<i64: 8, 128>}]} {
    %c0 = arith.constant 0 : index
    %c0_0 = arith.constant 0 : index
    %0 = vector.load %arg1[%c0, %c0_0] : memref<8x32xbf16, #tpu.memory_space<vmem>>, vector<8x32xbf16>
    %c0_1 = arith.constant 0 : index
    %c0_2 = arith.constant 0 : index
    %1 = vector.load %arg2[%c0_1, %c0_2] : memref<32x128xbf16, #tpu.memory_space<vmem>>, vector<32x128xbf16>
    %cst = arith.constant dense<0.000000e+00> : vector<8x128xf32>
    %2 = tpu.matmul %0, %1, %cst {dimension_numbers = #tpu.dot_dimension_numbers<[1], [0], [0], [1], [0, 0, 1, 1], [], []>} : vector<8x32xbf16>, vector<32x128xbf16>, vector<8x128xf32> -> vector<8x128xf32>
    %c0_3 = arith.constant 0 : index
    %c0_4 = arith.constant 0 : index
    %3 = vector.load %arg3[%c0_3, %c0_4] : memref<1x128xf32, #tpu.memory_space<vmem>>, vector<1x128xf32>
    %4 = vector.broadcast %3 : vector<1x128xf32> to vector<8x128xf32>
    %5 = arith.addf %2, %4 : vector<8x128xf32>
    %cst_5 = arith.constant 0.000000e+00 : f32
    %6 = vector.broadcast %cst_5 : f32 to vector<8x128xf32>
    %7 = arith.maximumf %5, %6 : vector<8x128xf32>
    %8 = arith.truncf %7 : vector<8x128xf32> to vector<8x128xbf16>
    %c0_6 = arith.constant 0 : index
    %c0_7 = arith.constant 0 : index
    %9 = vector.load %arg4[%c0_6, %c0_7] : memref<128x128xbf16, #tpu.memory_space<vmem>>, vector<128x128xbf16>
    %cst_8 = arith.constant dense<0.000000e+00> : vector<8x128xf32>
    %10 = tpu.matmul %8, %9, %cst_8 {dimension_numbers = #tpu.dot_dimension_numbers<[1], [0], [0], [1], [0, 0, 1, 1], [], []>} : vector<8x128xbf16>, vector<128x128xbf16>, vector<8x128xf32> -> vector<8x128xf32>
    %c0_9 = arith.constant 0 : index
    %c0_10 = arith.constant 0 : index
    %11 = vector.load %arg5[%c0_9, %c0_10] : memref<1x128xf32, #tpu.memory_space<vmem>>, vector<1x128xf32>
    %12 = vector.broadcast %11 : vector<1x128xf32> to vector<8x128xf32>
    %13 = arith.addf %10, %12 : vector<8x128xf32>
    %cst_11 = arith.constant 0.000000e+00 : f32
    %14 = vector.broadcast %cst_11 : f32 to vector<8x128xf32>
    %15 = arith.maximumf %13, %14 : vector<8x128xf32>
    %16 = arith.truncf %15 : vector<8x128xf32> to vector<8x128xbf16>
    %c0_12 = arith.constant 0 : index
    %c0_13 = arith.constant 0 : index
    %17 = vector.load %arg6[%c0_12, %c0_13] : memref<128x128xbf16, #tpu.memory_space<vmem>>, vector<128x128xbf16>
    %cst_14 = arith.constant dense<0.000000e+00> : vector<8x128xf32>
    %18 = tpu.matmul %16, %17, %cst_14 {dimension_numbers = #tpu.dot_dimension_numbers<[1], [0], [0], [1], [0, 0, 1, 1], [], []>} : vector<8x128xbf16>, vector<128x128xbf16>, vector<8x128xf32> -> vector<8x128xf32>
    %c0_15 = arith.constant 0 : index
    %c0_16 = arith.constant 0 : index
    %19 = vector.load %arg7[%c0_15, %c0_16] : memref<1x128xf32, #tpu.memory_space<vmem>>, vector<1x128xf32>
    %20 = vector.broadcast %19 : vector<1x128xf32> to vector<8x128xf32>
    %21 = arith.addf %18, %20 : vector<8x128xf32>
    %cst_17 = arith.constant dense<0xFF800000> : vector<8xf32>
    %22 = vector.multi_reduction <maximumf>, %21, %cst_17 [1] : vector<8x128xf32> to vector<8xf32>
    %23 = vector.shape_cast %22 : vector<8xf32> to vector<8x1xf32>
    %24 = vector.broadcast %23 : vector<8x1xf32> to vector<8x128xf32>
    %25 = arith.subf %21, %24 : vector<8x128xf32>
    %26 = math.exp %25 : vector<8x128xf32>
    %cst_18 = arith.constant dense<0.000000e+00> : vector<8xf32>
    %27 = vector.multi_reduction <add>, %26, %cst_18 [1] : vector<8x128xf32> to vector<8xf32>
    %28 = vector.shape_cast %27 : vector<8xf32> to vector<8x1xf32>
    %29 = math.log %28 : vector<8x1xf32>
    %30 = vector.broadcast %29 : vector<8x1xf32> to vector<8x128xf32>
    %31 = arith.subf %25, %30 : vector<8x128xf32>
    %c0_19 = arith.constant 0 : index
    %c0_20 = arith.constant 0 : index
    %32 = vector.load %arg8[%c0_19, %c0_20] : memref<8x128xf32, #tpu.memory_space<vmem>>, vector<8x128xf32>
    tpu.vector_store %arg8[%c0_19, %c0_20], %31 {strides = array<i32>} : memref<8x128xf32, #tpu.memory_space<vmem>>, vector<8x128xf32>,
    return
  }
  func.func @transform_0(%arg0: i32) -> (i32, i32) {
    %c0_i32 = arith.constant 0 : i32
    %c0_i32_0 = arith.constant 0 : i32
    return %arg0, %c0_i32 : i32, i32
  }
  func.func @transform_1(%arg0: i32) -> (i32, i32) {
    %c0_i32 = arith.constant 0 : i32
    %c0_i32_0 = arith.constant 0 : i32
    %c0_i32_1 = arith.constant 0 : i32
    return %c0_i32, %c0_i32_0 : i32, i32
  }
  func.func @transform_2(%arg0: i32) -> (i32, i32) {
    %c0_i32 = arith.constant 0 : i32
    %c0_i32_0 = arith.constant 0 : i32
    %c0_i32_1 = arith.constant 0 : i32
    return %c0_i32, %c0_i32_0 : i32, i32
  }
  func.func @transform_3(%arg0: i32) -> (i32, i32) {
    %c0_i32 = arith.constant 0 : i32
    %c0_i32_0 = arith.constant 0 : i32
    %c0_i32_1 = arith.constant 0 : i32
    return %c0_i32, %c0_i32_0 : i32, i32
  }
  func.func @transform_4(%arg0: i32) -> (i32, i32) {
    %c0_i32 = arith.constant 0 : i32
    %c0_i32_0 = arith.constant 0 : i32
    %c0_i32_1 = arith.constant 0 : i32
    return %c0_i32, %c0_i32_0 : i32, i32
  }
  func.func @transform_5(%arg0: i32) -> (i32, i32) {
    %c0_i32 = arith.constant 0 : i32
    %c0_i32_0 = arith.constant 0 : i32
    %c0_i32_1 = arith.constant 0 : i32
    return %c0_i32, %c0_i32_0 : i32, i32
  }
  func.func @transform_6(%arg0: i32) -> (i32, i32) {
    %c0_i32 = arith.constant 0 : i32
    %c0_i32_0 = arith.constant 0 : i32
    %c0_i32_1 = arith.constant 0 : i32
    return %c0_i32, %c0_i32_0 : i32, i32
  }
  func.func @transform_7(%arg0: i32) -> (i32, i32) {
    %c0_i32 = arith.constant 0 : i32
    %c0_i32_0 = arith.constant 0 : i32
    return %arg0, %c0_i32 : i32, i32
  }
}

</mosaic_0001>

<bundles_post_ra>
// kernel: tpu_custom_call.1
= control target key start
LH: loop header
LB: loop body
LE: loop exit
PB: predicated region body
PF: predicated region fallthrough
CT: control target
= control target key end

     0   :  { %12 = vsyncpa [#allocation3], 0  ;;  %s627_s0 = inlined_call_operand.hbm [shape: bf16[8,32], index: 0, kind: input, shape index: {}]   ;;  %s628_s1 = inlined_call_operand.hbm [shape: bf16[32,128], index: 1, kind: input, shape index: {}]   ;;  %s629_s2 = inlined_call_operand.vmem [shape: f32[1,128], index: 2, kind: input, shape index: {}]   ;;  %s630_s3 = inlined_call_operand.hbm [shape: bf16[128,128], index: 3, kind: input, shape index: {}]   ;;  %s631_s4 = inlined_call_operand.vmem [shape: f32[1,128], index: 4, kind: input, shape index: {}]   ;;  %s632_s5 = inlined_call_operand.hbm [shape: bf16[128,128], index: 5, kind: input, shape index: {}]   ;;  %s633_s6 = inlined_call_operand.vmem [shape: f32[1,128], index: 6, kind: input, shape index: {}]   ;;  %s634_s7 = inlined_call_operand.hbm [shape: f32[8,128], index: 7, kind: output, shape index: {}]  }
   0x1   :  { %13 = vsyncpa [#allocation6], 0 }
   0x2   :  { %14 = vsyncpa [#allocation9], 0  ;;  %s31_s26 = sshll.u32 %s628_s1, 4  ;;  %s32_s26 = int_to_ptr.hbm [resolvable:$true] %s31_s26 }
   0x3   :  { %15 = vsyncpa [#allocation4], 0  ;;  %s556_s27 = smov [#allocation5]   ;;  %s21_s8 = sshll.u32 %s627_s0, 4  ;;  %s22_s8 = int_to_ptr.hbm [resolvable:$true] %s21_s8 }
   0x4   :  { %s33_s28 = sshll.u32 %s556_s27, 4  ;;  %s557_s9 = smov 64   ;;  %s34_s28 = int_to_ptr.vmem [resolvable:$true] %s33_s28 }
   0x5   :  { %s558_s10 = smov 4   ;;  %s559_s11 = smov [#allocation2]  }
   0x6   :  { %39 = dma.hbm_to_vmem [thread:$0]  %s32_s26, 256, %s34_s28, [#allocation6], %s557_s9, %s557_s9, %s558_s10  }
   0x7   :  { %s23_s12 = sshll.u32 %s559_s11, 4  ;;  %s46_s15 = sshll.u32 %s630_s3, 4  ;;  %s24_s12 = int_to_ptr.vmem [resolvable:$true] %s23_s12  ;;  %s47_s15 = int_to_ptr.hbm [resolvable:$true] %s46_s15 }
   0x8   :  { %26 = dma.hbm_to_vmem [thread:$0]  %s22_s8, 64, %s24_s12, [#allocation3]  }
   0x9   :  { %s61_s17 = sshll.u32 %s632_s5, 4  ;;  %s560_s18 = smov [#allocation7]   ;;  %s62_s17 = int_to_ptr.hbm [resolvable:$true] %s61_s17 }
   0xa   :  { %s48_s19 = sshll.u32 %s560_s18, 4  ;;  %s561_s0 = smov [#allocation8]   ;;  %s49_s19 = int_to_ptr.vmem [resolvable:$true] %s48_s19 }
   0xb   :  { %54 = dma.hbm_to_vmem [thread:$0]  %s47_s15, 1024, %s49_s19, [#allocation6], %s557_s9, %s557_s9, %s558_s10  }
   0xc   :  { %s63_s20 = sshll.u32 %s561_s0, 4  ;;  %s64_s20 = int_to_ptr.vmem [resolvable:$true] %s63_s20 }
   0xd   :  { %69 = dma.hbm_to_vmem [thread:$0]  %s62_s17, 1024, %s64_s20, [#allocation9], %s557_s9, %s557_s9, %s558_s10  }
   0xe   :  { %548 = dma.done.wait [#allocation3], 64  }
   0xf   :  { %549 = vsyncadd [#allocation3], 4294967232 }
  0x10   :  { %550 = dma.done.wait [#allocation6], 1280  }
  0x11   :  { %551 = vsyncadd [#allocation6], 4294966016 }
  0x12   :  { %552 = dma.done.wait [#allocation9], 1024  }
  0x13   :  { %553 = vsyncadd [#allocation9], 4294966272  ;;  %v397_v0 = vld [vmem:[#allocation5 + $0x8] sm:$0xff]  ;;  %v396_v2 = vld [vmem:[#allocation5] sm:$0xff]  ;;  %vm110_vm0 = vcmask 261120   ;;  %s311_s27 = sshll.u32 %s634_s7, 4  ;;  %s312_s27 = int_to_ptr.hbm [resolvable:$true] %s311_s27 }
  0x14   :  { %v405_v1 = vld [vmem:[#allocation7 + $0x38] sm:$0xff]  ;;  %120 = vmatpush.bf16.msra.mxu0 %v397_v0  ;;  %v404_v3 = vld [vmem:[#allocation7 + $0x30] sm:$0xff]  ;;  %v89_v4 = vld [vmem:[#allocation2] sm:$0xf] }
  0x15   :  { %197 = vmatpush.bf16.msra.mxu1 %v405_v1  ;;  %v403_v5 = vld [vmem:[#allocation7 + $0x28] sm:$0xff]  ;;  %v402_v6 = vld [vmem:[#allocation7 + $0x20] sm:$0xff]  ;;  %v401_v7 = vld [vmem:[#allocation7 + $0x18] sm:$0xff] }
  0x16   :  { %v400_v8 = vld [vmem:[#allocation7 + $0x10] sm:$0xff]  ;;  %v399_v9 = vld [vmem:[#allocation7 + $0x8] sm:$0xff]  ;;  %v398_v10 = vld [vmem:[#allocation7] sm:$0xff] }
  0x17   :  { %v413_v11 = vld [vmem:[#allocation8 + $0x38] sm:$0xff]  ;;  %v412_v12 = vld [vmem:[#allocation8 + $0x30] sm:$0xff]  ;;  %v411_v13 = vld [vmem:[#allocation8 + $0x28] sm:$0xff] }
  0x18   :  { %121 = vmatpush.bf16.msra.mxu0 %v396_v2  ;;  %280 = vmatpush.bf16.msra.mxu2 %v413_v11  ;;  %v410_v14 = vld [vmem:[#allocation8 + $0x20] sm:$0xff]  ;;  %v409_v15 = vld [vmem:[#allocation8 + $0x18] sm:$0xff]  ;;  %v408_v16 = vld [vmem:[#allocation8 + $0x10] sm:$0xff] }
  0x19   :  { %198 = vmatpush.bf16.msra.mxu1 %v404_v3  ;;  %v421_v17 = vld [vmem:[%s629_s2] ss:$0 sm:$0xff]  ;;  %v406_v24 = vld [vmem:[#allocation8] sm:$0xff] }
  0x1a   :  { %v407_v23 = vld [vmem:[#allocation8 + $0x8] sm:$0xff] }
  0x1b   :  { %331 = vmatmul.msk.bf16.vlgmr.msra.gmra.mxu0 %vm110_vm0, %v89_v4  ;;  %v422_v25 = vld [vmem:[%s631_s4] ss:$0 sm:$0xff]  ;;  %s562_s4 = smov [#allocation10]  }
  0x1c   :  { %281 = vmatpush.bf16.msra.mxu2 %v412_v12  ;;  %v423_v31 = vld [vmem:[%s633_s6] ss:$0 sm:$0xff]  ;;  %s309_s24 = sshll.u32 %s562_s4, 4  ;;  %s310_s24 = int_to_ptr.vmem [resolvable:$true] %s309_s24 }
  0x1d   :  { %199 = vmatpush.bf16.msra.mxu1 %v403_v5 }
  0x20   :  { %282 = vmatpush.bf16.msra.mxu2 %v411_v13 }
  0x21   :  { %200 = vmatpush.bf16.msra.mxu1 %v402_v6 }
  0x24   :  { %283 = vmatpush.bf16.msra.mxu2 %v410_v14 }
  0x25   :  { %201 = vmatpush.bf16.msra.mxu1 %v401_v7 }
  0x28   :  { %284 = vmatpush.bf16.msra.mxu2 %v409_v15 }
  0x29   :  { %202 = vmatpush.bf16.msra.mxu1 %v400_v8 }
  0x2c   :  { %285 = vmatpush.bf16.msra.mxu2 %v408_v16 }
  0x2d   :  { %203 = vmatpush.bf16.msra.mxu1 %v399_v9 }
  0x30   :  { %286 = vmatpush.bf16.msra.mxu2 %v407_v23 }
  0x31   :  { %204 = vmatpush.bf16.msra.mxu1 %v398_v10 }
  0x34   :  { %287 = vmatpush.bf16.msra.mxu2 %v406_v24 }
  0x98   :  { %v123_v18 = vpop.f32.mrf.mxu0 }
  0x99   :  { %v124_v19 = vadd.f32 %v421_v17, %v123_v18 }
  0x9b   :  { %v127_v20 = vmax.f32 %v124_v19, 0.0 }
  0x9d   :  { %v128_v21 = vpack.c.bf16 %v127_v20, %v127_v20 }
  0x9f   :  { %205 = vmatmul.bf16.vlgmr.msra.gmra.mxu1 %v128_v21 }
  0xa0   :  { %v125_v22 = vpop.f32.mrf.mxu0 }
 0x11c   :  { %v206_v26 = vpop.f32.mrf.mxu1 }
 0x11d   :  { %v207_v27 = vadd.f32 %v422_v25, %v206_v26 }
 0x11f   :  { %v210_v28 = vmax.f32 %v207_v27, 0.0 }
 0x121   :  { %v211_v29 = vpack.c.bf16 %v210_v28, %v210_v28 }
 0x123   :  { %288 = vmatmul.bf16.vlgmr.msra.gmra.mxu2 %v211_v29 }
 0x124   :  { %v208_v30 = vpop.f32.mrf.mxu1 }
 0x1a6   :  { %v289_v32 = vpop.f32.mrf.mxu2 }
 0x1a7   :  { %v290_v33 = vadd.f32 %v423_v31, %v289_v32 }
 0x1a9   :  { %293 = vmax.xlane.f32.xlu0 %v290_v33 }
 0x1ae   :  { %v291_v34 = vpop.f32.mrf.mxu2 }
 0x21c   :  { %v294_v35 = vpop.xlane.xlu0 %293 }
 0x21d   :  { %v295_v36 = vsub.f32 %v290_v33, %v294_v35 }
 0x21f   :  { %v296_v37 = vmul.f32 1.442695, %v295_v36 }
 0x221   :  { %424 = vpow2.f32 %v296_v37 }
 0x227   :  { %v425_v38 = vpop.eup %424 }
 0x228   :  { %298 = vadd.xlane.f32.xlu0 %v425_v38 }
 0x29b   :  { %v299_v39 = vpop.xlane.xlu0 %298 }
 0x29c   :  { %426 = vlog2.f32 %v299_v39 }
 0x2a2   :  { %v427_v40 = vpop.eup %426 }
 0x2a3   :  { %v301_v41 = vmul.f32 0.6931472, %v427_v40 }
 0x2a5   :  { %v302_v42 = vsub.f32 %v295_v36, %v301_v41 }
 0x2a7   :  { %303 = vst [vmem:[#allocation10] sm:$0xff] %v302_v42 }
 0x2a8   :  { %314 = dma.vmem_to_hbm [thread:$0]  %s310_s24, 128, %s312_s27, [#allocation4]  }
 0x2a9   :  { %554 = dma.done.wait [#allocation4], 128  }
 0x2aa   :  { %555 = vsyncadd [#allocation4], 4294967168 }
 0x2ab   :  { %319 = vsyncpa [#allocation3], 1 }
 0x2ac   :  { %320 = vsyncpa [#allocation6], 1 }
 0x2ad   :  { %321 = vsyncpa [#allocation9], 1 }
 0x2ae   :  { %322 = vsyncpa [#allocation4], 1 }

</bundles_post_ra>
